<compile_context>
chip_gen: v7x
topology: tpu7x:2x2x1
jax: 0.10.0
libtpu: 0.0.40
codegen_flags: <defaults>
</compile_context>

<pallas_src>
import functools

import numpy as np
import jax
import jax.numpy as jnp
from jax.experimental import pallas as pl
from jax.experimental.pallas import tpu as pltpu

_MEAN = np.array([0.485, 0.456, 0.406], np.float32)
_STD = np.array([0.229, 0.224, 0.225], np.float32)


# ----------------------------- small helpers ------------------------------

def _row_tiling(m):
    """Right-sized row tile: multiple of 8, >=2 grid steps when possible."""
    m8 = ((m + 7) // 8) * 8
    if m8 % 256 == 0:
        tm = 128                     # >= 2 "parallel" steps (v7x megacore)
    elif m8 % 16 == 0 and m8 >= 32:
        tm = m8 // 2
    else:
        tm = m8
    return tm, m8 // tm, m8


# ----------------------------- Pallas kernels -----------------------------

def pallas_backbone_in_conv(x, w_b, b_b, w_in, b_in):
    """Fused backbone stand-in + in_conv: relu(x@w_b+b_b) @ w_in + b_in.

    Weights arrive pre-cast to bf16; the x row tiles are cast to bf16 before
    the call so only bf16 bytes cross HBM and no casts run in the kernel.
    """
    m, k = x.shape
    n1 = w_b.shape[1]
    n2 = w_in.shape[1]
    tm, grid, m8 = _row_tiling(m)
    x_p = jnp.pad(x.astype(jnp.float32), ((0, m8 - m), (0, 0))).astype(jnp.bfloat16)

    def kernel(x_ref, wb_ref, bb_ref, wi_ref, bi_ref, o_ref):
        h = jnp.maximum(
            jnp.dot(x_ref[...], wb_ref[...], preferred_element_type=jnp.float32)
            + bb_ref[...], 0.0)
        o_ref[...] = jnp.dot(h.astype(jnp.bfloat16), wi_ref[...],
                             preferred_element_type=jnp.float32) + bi_ref[...]

    out = pl.pallas_call(
        kernel,
        out_shape=jax.ShapeDtypeStruct((m8, n2), jnp.float32),
        grid_spec=pltpu.PrefetchScalarGridSpec(
            num_scalar_prefetch=0,
            grid=(grid,),
            in_specs=[pl.BlockSpec((tm, k), lambda i: (i, 0)),
                      pl.BlockSpec((k, n1), lambda i: (0, 0)),
                      pl.BlockSpec((1, n1), lambda i: (0, 0)),
                      pl.BlockSpec((n1, n2), lambda i: (0, 0)),
                      pl.BlockSpec((1, n2), lambda i: (0, 0))],
            out_specs=pl.BlockSpec((tm, n2), lambda i: (i, 0)),
        ),
        compiler_params=pltpu.CompilerParams(dimension_semantics=("parallel",)),
    )(x_p, w_b, b_b.reshape(1, n1).astype(jnp.float32),
      w_in, b_in.reshape(1, n2).astype(jnp.float32))
    return out[:m]


def _safecount_fused_kernel(fq_ref, wsim_ref, bsim_ref, wo_ref, bo_ref,
                            wc1_ref, bc1_ref, wc2_ref, bc2_ref,
                            wagg_ref, wr1_ref, br1_ref, wr2_ref, br2_ref,
                            maskl_ref, maskr_ref,
                            dens_ref, peaks_ref,
                            buf_c, buf_m, buf_d,
                            *, H, W, C, M, head, num_block, pad):
    """All SAFECount blocks + regressor + peak count in one kernel."""
    HW = H * W
    c3 = 3 * C
    m3 = 3 * M

    # Zero only the halo rows: body rows [pad, pad+HW) are fully rewritten by
    # every conv3x3 below, so the halos stay zero (== zero padding).
    for buf in (buf_c, buf_m, buf_d):
        zero = jnp.zeros((pad, buf.shape[1]), buf.dtype)
        buf[0:pad, :] = zero
        buf[pad + HW:pad + HW + pad, :] = zero

    mask_l = maskl_ref[...]          # (HW,1) 1.0 where column x-1 is in-image
    mask_r = maskr_ref[...]          # (HW,1) 1.0 where column x+1 is in-image

    def lr_slab(x):
        # [x(<-1) | x | x(+1)]: the two +/-1 column shifts go through the XLU
        # (pltpu.roll) instead of sublane-misaligned slices; edge masks are
        # applied once here rather than per tap.
        xl = pltpu.roll(x, 1, 0) * mask_l
        xr = pltpu.roll(x, HW - 1, 0) * mask_r
        return jnp.concatenate([xl, x, xr], axis=1)

    def conv3x3(buf, x, weight_at):
        """3x3 'same' conv, zero padded; 9 taps grouped into 3 row-aligned
        K=3*Cin MXU matmuls (dy = -1, 0, +1)."""
        buf[pad:pad + HW, :] = lr_slab(x).astype(buf.dtype)
        acc = None
        for d in range(3):
            off = pad + (d - 1) * W
            r = jnp.dot(buf[off:off + HW, :], weight_at(d),
                        preferred_element_type=jnp.float32)
            acc = r if acc is None else acc + r
        return acc

    fq = fq_ref[...]                                                 # (HW, C) f32
    for blk in range(num_block):
        # q projection folded into the tap weights at pack time; bq's
        # edge-aware contribution arrives as the precomputed bias map BSIM.
        sim = conv3x3(buf_c, fq,
                      lambda d: wsim_ref[blk, d * c3:(d + 1) * c3, :])
        sim = sim + bsim_ref[blk]                                    # (HW, head*M)
        # TODO(synk): exact SAFECount exemplar+spatial normalization was not
        # provided; per-head exemplar softmax averaged over heads (in-register).
        attn = None
        for h in range(head):
            s_h = sim[:, h * M:(h + 1) * M]
            e_h = jnp.exp(s_h - jnp.max(s_h, axis=-1, keepdims=True))
            p_h = e_h * pl.reciprocal(jnp.sum(e_h, axis=-1, keepdims=True),
                                      approx=True)
            attn = p_h if attn is None else attn + p_h
        attn = attn * (1.0 / head)                                   # (HW, M)
        # similarity-weighted aggregation == conv_transpose2d(attn, fs, pad=1)
        agg = conv3x3(buf_m, attn,
                      lambda d: wagg_ref[d * m3:(d + 1) * m3, :])    # (HW, C)
        # 1x1 output projection + residual + FFN (dropout = 0 in eval)
        fq = fq + jnp.dot(agg.astype(jnp.bfloat16), wo_ref[blk],
                          preferred_element_type=jnp.float32) + bo_ref[blk]
        h1 = jnp.maximum(
            jnp.dot(fq.astype(jnp.bfloat16), wc1_ref[blk],
                    preferred_element_type=jnp.float32) + bc1_ref[blk], 0.0)
        fq = fq + jnp.dot(h1.astype(jnp.bfloat16), wc2_ref[blk],
                          preferred_element_type=jnp.float32) + bc2_ref[blk]

    # TODO(synk): exact Regressor (FamNet-style upsampling stack) not provided;
    # stand-in: conv3x3(C->C)+ReLU then a 1-wide head done as a VPU reduce.
    r1 = jnp.maximum(
        conv3x3(buf_c, fq, lambda d: wr1_ref[d * c3:(d + 1) * c3, :])
        + br1_ref[...], 0.0)                                         # (HW, C)
    dens = jnp.maximum(jnp.sum(r1 * wr2_ref[...], axis=-1, keepdims=True)
                       + br2_ref[...], 0.0)                          # (HW, 1)
    # TODO(synk): at realistic H,W the density should be emitted lane-dense
    # (H, W); kept (HW, 1) here to avoid an in-kernel relayout at toy sizes.
    dens_ref[...] = dens

    # fused DetectPeaks().sum(): 3x3 max filter, strictly-positive centers
    buf_d[pad:pad + HW, :] = lr_slab(dens)
    mx3 = None
    for d in range(3):
        off = pad + (d - 1) * W
        a = buf_d[off:off + HW, :]
        mx3 = a if mx3 is None else jnp.maximum(mx3, a)
    mx = jnp.max(mx3, axis=-1, keepdims=True)
    is_peak = jnp.logical_and(dens >= mx, dens > 0.0).astype(jnp.float32)
    peaks_ref[...] = jnp.sum(is_peak, axis=0, keepdims=True)


def safecount_regress_count(fq0, fs, params, cfg, H, W):
    """Pack weights (bf16, q folded) and run the fused SAFECount kernel."""
    head = cfg["head"]
    blocks = params["blocks"]
    num_block = len(blocks)
    M = fs.shape[0]
    embed = fs.shape[-1]
    mid = blocks[0]["w_q"].shape[1]
    assert embed == mid, "fused kernel assumes embed_dim == mid_dim"
    d_h = mid // head
    scale = 1.0 / np.sqrt(9 * d_h)
    HW = H * W
    C = embed
    hM = head * M

    # -------- pack-time prep (plain XLA: layout-only + tiny matmuls) --------
    fs_flat = fs.reshape(M * 9, embed).astype(jnp.float32)
    headmask = ((jnp.arange(mid) // d_h)[:, None]
                == jnp.arange(head)[None, :]).astype(jnp.float32)    # (C, head)

    # per-position 3x3 tap validity (for the exact fold of bq into a bias map)
    ys, xs = np.divmod(np.arange(HW, dtype=np.int64), W)
    valid_np = np.zeros((HW, 9), np.float32)
    for t in range(9):
        dy, dx = divmod(t, 3)
        valid_np[:, t] = ((ys + dy - 1 >= 0) & (ys + dy - 1 < H) &
                          (xs + dx - 1 >= 0) & (xs + dx - 1 < W))
    valid = jnp.asarray(valid_np)

    wsim_l, bsim_l = [], []
    for bi in range(num_block):
        blkp = blocks[bi]
        # support-side k projection: a 36-row matmul -> plain XLA (its result
        # is immediately consumed by layout repacking anyway).
        k_b = (fs_flat @ blkp["w_k"] + blkp["b_k"]).reshape(M, 3, 3, mid)
        k_t = jnp.transpose(k_b, (1, 2, 3, 0)).reshape(9, mid, M)    # [tap,c,m]
        w = scale * k_t[:, :, None, :] * headmask[None, :, :, None]
        w = w.reshape(9, mid, hM)                                    # (9, C, hM)
        # fold the 1x1 q projection into the tap weights (exact):
        w_fold = jnp.einsum("ec,tcn->ten", blkp["w_q"], w)           # (9, C, hM)
        wsim_l.append(w_fold.reshape(9 * C, hM))
        b_tap = jnp.einsum("c,tcn->tn", blkp["b_q"], w)              # (9, hM)
        bsim_l.append(valid @ b_tap)                                 # (HW, hM)
    WSIM = jnp.stack(wsim_l).astype(jnp.bfloat16)                    # (B, 9C, hM)
    BSIM = jnp.stack(bsim_l).astype(jnp.float32)                     # (B, HW, hM)

    fs_flip = fs[:, ::-1, ::-1, :]
    WAGG = jnp.transpose(fs_flip.reshape(M, 9, embed),
                         (1, 0, 2)).reshape(9 * M, embed).astype(jnp.bfloat16)

    WO = jnp.stack([b["w_o"] for b in blocks]).astype(jnp.bfloat16)
    BO = jnp.stack([b["b_o"].reshape(1, -1) for b in blocks]).astype(jnp.float32)
    WC1 = jnp.stack([b["w_c1"] for b in blocks]).astype(jnp.bfloat16)
    BC1 = jnp.stack([b["b_c1"].reshape(1, -1) for b in blocks]).astype(jnp.float32)
    WC2 = jnp.stack([b["w_c2"] for b in blocks]).astype(jnp.bfloat16)
    BC2 = jnp.stack([b["b_c2"].reshape(1, -1) for b in blocks]).astype(jnp.float32)
    WR1 = params["w_r1"].astype(jnp.bfloat16)                        # (9C, mid)
    BR1 = params["b_r1"].reshape(1, -1).astype(jnp.float32)
    WR2 = params["w_r2"].reshape(1, -1).astype(jnp.float32)
    BR2 = params["b_r2"].reshape(1, 1).astype(jnp.float32)

    xcol = np.arange(HW, dtype=np.int64) % W
    MASKL = jnp.asarray((xcol >= 1).astype(np.float32).reshape(HW, 1))
    MASKR = jnp.asarray((xcol <= W - 2).astype(np.float32).reshape(HW, 1))

    inputs = (fq0.astype(jnp.float32), WSIM, BSIM, WO, BO, WC1, BC1, WC2, BC2,
              WAGG, WR1, BR1, WR2, BR2, MASKL, MASKR)

    pad = ((max(W, 8) + 15) // 16) * 16        # >= W halo rows, bf16-aligned
    kernel = functools.partial(_safecount_fused_kernel, H=H, W=W, C=C, M=M,
                               head=head, num_block=num_block, pad=pad)

    scratch = [pltpu.VMEM((HW + 2 * pad, 3 * C), jnp.bfloat16),
               pltpu.VMEM((HW + 2 * pad, 3 * M), jnp.bfloat16),
               pltpu.VMEM((HW + 2 * pad, 3), jnp.float32)]
    scratch_bytes = ((HW + 2 * pad) * (3 * C) * 2
                     + (HW + 2 * pad) * (3 * M) * 2
                     + (HW + 2 * pad) * 3 * 4)
    in_bytes = sum(int(a.size) * a.dtype.itemsize for a in inputs)
    vmem_limit = int(min(64 << 20,
                         max(32 << 20,
                             2 * (in_bytes + HW * 4 + 4)
                             + scratch_bytes + (4 << 20))))

    def full_spec(shape):
        zeros = (0,) * len(shape)
        return pl.BlockSpec(shape, lambda i: zeros)

    # TODO(synk): grid=(1,) keeps the fused chain on one TensorCore; a 2-way
    # row split with a W-row recompute halo would engage v7x's second core and
    # halve per-core VMEM residency at realistic H*W.
    dens, peaks = pl.pallas_call(
        kernel,
        out_shape=(jax.ShapeDtypeStruct((HW, 1), jnp.float32),
                   jax.ShapeDtypeStruct((1, 1), jnp.float32)),
        grid_spec=pltpu.PrefetchScalarGridSpec(
            num_scalar_prefetch=0,
            grid=(1,),
            in_specs=[full_spec(tuple(a.shape)) for a in inputs],
            out_specs=[pl.BlockSpec((HW, 1), lambda i: (0, 0)),
                       pl.BlockSpec((1, 1), lambda i: (0, 0))],
            scratch_shapes=scratch,
        ),
        compiler_params=pltpu.CompilerParams(
            dimension_semantics=("arbitrary",),
            vmem_limit_bytes=vmem_limit),
    )(*inputs)
    return dens, peaks


# ------------------------------- glue -------------------------------------

def normalize_nchw(img):
    """torchvision Normalize on a (1,3,H,W) image; returns (H,W,3)."""
    x = jnp.transpose(img[0], (1, 2, 0)).astype(jnp.float32)
    return (x - _MEAN) / _STD


def backbone_in_conv(x_hwc, w_b, b_b, w_in, b_in, out_stride):
    # TODO(synk): the frozen pretrained ResNet is not provided; stand-in is a
    # kernel=stride=out_stride patch-embed conv (exact space-to-depth + matmul)
    # fused with the 1x1 in_conv in a single pallas_call.
    H, W, Cc = x_hwc.shape
    s = out_stride
    h, w = H // s, W // s
    x = x_hwc.reshape(h, s, w, s, Cc).transpose(0, 2, 1, 3, 4).reshape(h * w, s * s * Cc)
    f = pallas_backbone_in_conv(x, w_b, b_b, w_in, b_in)
    return f, h, w


def crop_roi_feat(feat_hwc, boxes_np, out_stride):
    """Same math as the reference crop_roi_feat, channels-last layout."""
    h, w, _ = feat_hwc.shape
    bs = np.asarray(boxes_np, np.float64) / out_stride
    bs[:, :2] = np.floor(bs[:, :2])
    bs[:, 2:] = np.ceil(bs[:, 2:])
    bs[:, :2] = np.maximum(bs[:, :2], 0.0)
    bs[:, 2] = np.minimum(bs[:, 2], h)
    bs[:, 3] = np.minimum(bs[:, 3], w)
    crops = []
    for i in range(bs.shape[0]):
        y_tl, x_tl, y_br, x_br = (int(v) for v in bs[i])
        crops.append(feat_hwc[y_tl:y_br + 1, x_tl:x_br + 1, :])
    return crops


# ------------------------------ forward ------------------------------------

def hlsafecount_forward(image, image_support, boxes_support, params, cfg):
    out_stride = cfg["out_stride"]
    img = normalize_nchw(image)
    sup = normalize_nchw(image_support)
    boxes = np.asarray(boxes_support)[0]                 # (M0, 4), static

    # backbone/in_conv weights packed once as bf16 (no per-use casts).
    w_b = params["w_backbone"].astype(jnp.bfloat16)
    w_in = params["w_in"].astype(jnp.bfloat16)
    b_b = params["b_backbone"]
    b_in = params["b_in"]

    # query branch: fused backbone stand-in + in_conv (one kernel)
    fq0, H, W = backbone_in_conv(img, w_b, b_b, w_in, b_in, out_stride)

    # support branch over exemplar scales (resize / ROI crop is layout glue)
    h_img, w_img = sup.shape[0], sup.shape[1]
    feat_boxes = []
    for scale in cfg["exemplar_scales"]:
        h_rsz = int(h_img * scale) // 16 * 16
        w_rsz = int(w_img * scale) // 16 * 16
        # NOTE: reproduces the reference's size=(w_rsz, h_rsz) argument order.
        sup_s = jax.image.resize(sup, (w_rsz, h_rsz, 3), method="bilinear")
        scale_h = h_rsz / h_img
        scale_w = w_rsz / w_img
        boxes_s = boxes.astype(np.float64).copy()
        boxes_s[:, 0] *= scale_h
        boxes_s[:, 1] *= scale_w
        boxes_s[:, 2] *= scale_h
        boxes_s[:, 3] *= scale_w
        fsf, hs, ws = backbone_in_conv(sup_s, w_b, b_b, w_in, b_in, out_stride)
        fs_map = fsf.reshape(hs, ws, -1)
        for crop in crop_roi_feat(fs_map, boxes_s, out_stride):
            feat_boxes.append(
                jax.image.resize(crop, (3, 3, crop.shape[-1]), method="bilinear"))
    fs = jnp.stack(feat_boxes, axis=0)                   # (M, 3, 3, embed)

    # fused SAFECount blocks + regressor + peak count (one kernel)
    dens, peaks = safecount_regress_count(fq0, fs, params, cfg, H, W)

    density_nchw = dens.reshape(H, W)[None, None, :, :]  # back to NCHW (1,1,H,W)
    return density_nchw, peaks[0, 0]


# --------------------------- parameter init --------------------------------

def init_params(key, backbone_out_dim, embed_dim, mid_dim, num_block, out_stride):
    keys = iter(jax.random.split(key, 8 + 8 * num_block))

    def nrm(shape):
        return 0.02 * jax.random.normal(next(keys), shape, jnp.float32)

    params = {
        "w_backbone": nrm((out_stride * out_stride * 3, backbone_out_dim)),
        "b_backbone": jnp.zeros((backbone_out_dim,), jnp.float32),
        "w_in": nrm((backbone_out_dim, embed_dim)),
        "b_in": jnp.zeros((embed_dim,), jnp.float32),
        "w_r1": nrm((9 * embed_dim, mid_dim)),
        "b_r1": jnp.zeros((mid_dim,), jnp.float32),
        "w_r2": nrm((mid_dim, 1)),
        "b_r2": jnp.zeros((1,), jnp.float32),
        "blocks": [],
    }
    for _ in range(num_block):
        params["blocks"].append({
            "w_q": nrm((embed_dim, mid_dim)), "b_q": jnp.zeros((mid_dim,), jnp.float32),
            "w_k": nrm((embed_dim, mid_dim)), "b_k": jnp.zeros((mid_dim,), jnp.float32),
            "w_o": nrm((embed_dim, embed_dim)), "b_o": jnp.zeros((embed_dim,), jnp.float32),
            "w_c1": nrm((embed_dim, mid_dim)), "b_c1": jnp.zeros((mid_dim,), jnp.float32),
            "w_c2": nrm((mid_dim, embed_dim)), "b_c2": jnp.zeros((embed_dim,), jnp.float32),
        })
    return params


# --------------------------------- main -------------------------------------

if __name__ == "__main__":
    key = jax.random.PRNGKey(0)
    cfg = dict(out_stride=4, head=4, exemplar_scales=[1.0, 0.75])
    embed_dim, mid_dim, num_block, backbone_out_dim = 32, 32, 2, 16

    k1, k2, k3 = jax.random.split(key, 3)
    image = jax.random.uniform(k1, (1, 3, 64, 64), jnp.float32)
    image_support = jax.random.uniform(k2, (1, 3, 64, 64), jnp.float32)
    # boxes_support: (1, M, 4) with [y_tl, x_tl, y_br, x_br] in image coords
    boxes_support = np.array([[[8.0, 8.0, 40.0, 40.0],
                               [20.0, 16.0, 56.0, 52.0]]], np.float32)

    params = init_params(k3, backbone_out_dim, embed_dim, mid_dim, num_block,
                         cfg["out_stride"])

    density, peaks = hlsafecount_forward(image, image_support, boxes_support,
                                         params, cfg)
    jax.block_until_ready((density, peaks))
    assert density.shape == (1, 1, 16, 16)
    print("KERNEL_OK")
</pallas_src>

<mosaic_0001>
module attributes {stable_mosaic.version = 11 : i64} {
  func.func @kernel(%arg0: i32, %arg1: memref<128x48xbf16, #tpu.memory_space<vmem>>, %arg2: memref<48x16xbf16, #tpu.memory_space<vmem>>, %arg3: memref<1x16xf32, #tpu.memory_space<vmem>>, %arg4: memref<16x32xbf16, #tpu.memory_space<vmem>>, %arg5: memref<1x32xf32, #tpu.memory_space<vmem>>, %arg6: memref<128x32xf32, #tpu.memory_space<vmem>>) attributes {dimension_semantics = [#tpu.dimension_semantics<parallel>], iteration_bounds = array<i64: 2>, scalar_prefetch = 0 : i64, scratch_operands = 0 : i64, tpu.core_type = #tpu.core_type<tc>, window_params = [{transform_indices = @transform_0, window_bounds = array<i64: 128, 48>}, {pipeline_mode = #tpu.pipeline_mode<synchronous>, transform_indices = @transform_1, window_bounds = array<i64: 48, 16>}, {pipeline_mode = #tpu.pipeline_mode<synchronous>, transform_indices = @transform_2, window_bounds = array<i64: 1, 16>}, {pipeline_mode = #tpu.pipeline_mode<synchronous>, transform_indices = @transform_3, window_bounds = array<i64: 16, 32>}, {pipeline_mode = #tpu.pipeline_mode<synchronous>, transform_indices = @transform_4, window_bounds = array<i64: 1, 32>}, {transform_indices = @transform_5, window_bounds = array<i64: 128, 32>}]} {
    %c0 = arith.constant 0 : index
    %c0_0 = arith.constant 0 : index
    %0 = vector.load %arg1[%c0, %c0_0] : memref<128x48xbf16, #tpu.memory_space<vmem>>, vector<128x48xbf16>
    %c0_1 = arith.constant 0 : index
    %c0_2 = arith.constant 0 : index
    %1 = vector.load %arg2[%c0_1, %c0_2] : memref<48x16xbf16, #tpu.memory_space<vmem>>, vector<48x16xbf16>
    %cst = arith.constant dense<0.000000e+00> : vector<128x16xf32>
    %2 = tpu.matmul %0, %1, %cst {dimension_numbers = #tpu.dot_dimension_numbers<[1], [0], [0], [1], [0, 0, 1, 1], [], []>} : vector<128x48xbf16>, vector<48x16xbf16>, vector<128x16xf32> -> vector<128x16xf32>
    %c0_3 = arith.constant 0 : index
    %c0_4 = arith.constant 0 : index
    %3 = vector.load %arg3[%c0_3, %c0_4] : memref<1x16xf32, #tpu.memory_space<vmem>>, vector<1x16xf32>
    %4 = vector.broadcast %3 : vector<1x16xf32> to vector<128x16xf32>
    %5 = arith.addf %2, %4 : vector<128x16xf32>
    %cst_5 = arith.constant 0.000000e+00 : f32
    %6 = vector.broadcast %cst_5 : f32 to vector<128x16xf32>
    %7 = arith.maximumf %5, %6 : vector<128x16xf32>
    %8 = arith.truncf %7 : vector<128x16xf32> to vector<128x16xbf16>
    %c0_6 = arith.constant 0 : index
    %c0_7 = arith.constant 0 : index
    %9 = vector.load %arg4[%c0_6, %c0_7] : memref<16x32xbf16, #tpu.memory_space<vmem>>, vector<16x32xbf16>
    %cst_8 = arith.constant dense<0.000000e+00> : vector<128x32xf32>
    %10 = tpu.matmul %8, %9, %cst_8 {dimension_numbers = #tpu.dot_dimension_numbers<[1], [0], [0], [1], [0, 0, 1, 1], [], []>} : vector<128x16xbf16>, vector<16x32xbf16>, vector<128x32xf32> -> vector<128x32xf32>
    %c0_9 = arith.constant 0 : index
    %c0_10 = arith.constant 0 : index
    %11 = vector.load %arg5[%c0_9, %c0_10] : memref<1x32xf32, #tpu.memory_space<vmem>>, vector<1x32xf32>
    %12 = vector.broadcast %11 : vector<1x32xf32> to vector<128x32xf32>
    %13 = arith.addf %10, %12 : vector<128x32xf32>
    %c0_11 = arith.constant 0 : index
    %c0_12 = arith.constant 0 : index
    %14 = vector.load %arg6[%c0_11, %c0_12] : memref<128x32xf32, #tpu.memory_space<vmem>>, vector<128x32xf32>
    tpu.vector_store %arg6[%c0_11, %c0_12], %13 {strides = array<i32>} : memref<128x32xf32, #tpu.memory_space<vmem>>, vector<128x32xf32>,
    return
  }
  func.func @transform_0(%arg0: i32) -> (i32, i32) {
    %c0_i32 = arith.constant 0 : i32
    %c0_i32_0 = arith.constant 0 : i32
    return %arg0, %c0_i32 : i32, i32
  }
  func.func @transform_1(%arg0: i32) -> (i32, i32) {
    %c0_i32 = arith.constant 0 : i32
    %c0_i32_0 = arith.constant 0 : i32
    %c0_i32_1 = arith.constant 0 : i32
    return %c0_i32, %c0_i32_0 : i32, i32
  }
  func.func @transform_2(%arg0: i32) -> (i32, i32) {
    %c0_i32 = arith.constant 0 : i32
    %c0_i32_0 = arith.constant 0 : i32
    %c0_i32_1 = arith.constant 0 : i32
    return %c0_i32, %c0_i32_0 : i32, i32
  }
  func.func @transform_3(%arg0: i32) -> (i32, i32) {
    %c0_i32 = arith.constant 0 : i32
    %c0_i32_0 = arith.constant 0 : i32
    %c0_i32_1 = arith.constant 0 : i32
    return %c0_i32, %c0_i32_0 : i32, i32
  }
  func.func @transform_4(%arg0: i32) -> (i32, i32) {
    %c0_i32 = arith.constant 0 : i32
    %c0_i32_0 = arith.constant 0 : i32
    %c0_i32_1 = arith.constant 0 : i32
    return %c0_i32, %c0_i32_0 : i32, i32
  }
  func.func @transform_5(%arg0: i32) -> (i32, i32) {
    %c0_i32 = arith.constant 0 : i32
    %c0_i32_0 = arith.constant 0 : i32
    return %arg0, %c0_i32 : i32, i32
  }
}

</mosaic_0001>

<bundles_post_ra>
// kernel: tpu_custom_call.1
= control target key start
LH: loop header
LB: loop body
LE: loop exit
PB: predicated region body
PF: predicated region fallthrough
CT: control target
= control target key end

     0   :  { %s831_s18 = smov 0   ;;  %s920_s0 = inlined_call_operand.vmem [shape: bf16[256,48], index: 0, kind: input, shape index: {}]   ;;  %s921_s1 = inlined_call_operand.vmem [shape: bf16[48,16], index: 1, kind: input, shape index: {}]   ;;  %s922_s2 = inlined_call_operand.vmem [shape: f32[1,16], index: 2, kind: input, shape index: {}]   ;;  %s923_s3 = inlined_call_operand.vmem [shape: bf16[16,32], index: 3, kind: input, shape index: {}]   ;;  %s924_s4 = inlined_call_operand.vmem [shape: f32[1,32], index: 4, kind: input, shape index: {}]   ;;  %s925_s5 = inlined_call_operand.vmem [shape: f32[256,32], index: 5, kind: output, shape index: {}]  }
   0x1 LB: > { %s672_s19 = sadd.s32 4294967295, %s799_s18   ;;  %p676_p0 = scmp.ge.s32.totalorder %s799_s18, 1  ;;  %s799_s18 = sphi %s831_s18, %s15_s18  }
   0x2   : > { %p188_p1 = scmp.lt.s32.totalorder %s799_s18, 3 }
   0x4   : > { %p189_p2 = pnand %p676_p0, %p188_p1 }
   0x5   : > { %v781_v0 = vld [vmem:[%s921_s1] sm:$0xff] (!%p189_p2)   ;;  %s677_s22 = sshll.u32 (!%p189_p2), %s672_s19, 4  ;;  %v782_v1 = vld [vmem:[%s921_s1 + $0x8] sm:$0xff] (!%p189_p2)   ;;  %v783_v2 = vld [vmem:[%s921_s1 + $0x10] sm:$0xff] (!%p189_p2)   ;;  %vm316_vm0 = vcmask (!%p189_p2), 392192   ;;  %vm477_vm1 = vcmask (!%p189_p2), 130048  }
   0x6   : > { %192 = sbr.rel (%p189_p2) target bundleno = 482 (0x1e2), region = 40  ;;  %p217_p3 = scmp.lt.s32.totalorder (!%p189_p2), %s677_s22, 31  ;;  %733 = vmatprep.subr.bf16.mxu0 (!%p189_p2), %v781_v0  ;;  %v792_v11 = vld [vmem:[%s923_s3] sm:$0xff] (!%p189_p2)   ;;  %vm599_vm2 = vcmask (!%p189_p2), 261120  }
   0x7   : > { %734 = vmatpush3.bf16.msra.mxu0 (!%p189_p2), %v781_v0  ;;  %755 = vmatprep.subr.bf16.mxu1 (!%p189_p2), %v792_v11  ;;  %v681_v12 = vld [vmem:[%s922_s2] ss:$0 sm:$0xff] (!%p189_p2) }
   0x8   : > { %735 = vmatprep.subr.bf16.mxu0 (!%p189_p2), %v782_v1  ;;  %756 = vmatpush3.bf16.msra.mxu1 (!%p189_p2), %v792_v11 }
   0xb   : > { %736 = vmatpush3.bf16.msra.mxu0 (!%p189_p2), %v782_v1 }
   0xc   : > { %737 = vmatprep.subr.bf16.mxu0 (!%p189_p2), %v783_v2 }
   0xd   : > { %s927_s22 = smov (!%p217_p3, %s677_s22), 31 }
   0xe   : > { %s678_s27 = sshll.u32 %s927_s22, 2  ;;  %s680_s10 = sshll.u32 %s927_s22, 3 }
   0xf   : > { %s220_s30 = scalar_lea.vmem %s920_s0, %s678_s27  ;;  %738 = vmatpush3.bf16.msra.mxu0 %v783_v2  ;;  %s883_s15 = scalar_lea.vmem %s925_s5, %s680_s10 }
  0x10   : > { %v784_v3 = vld [vmem:[%s220_s30] sm:$0xff]   ;;  %v785_v4 = vld [vmem:[%s220_s30 + $0x8] sm:$0xff]   ;;  %v786_v5 = vld [vmem:[%s220_s30 + $0x10] sm:$0xff]  }
  0x11   : > { %739 = vmatprep.mubr.msk.bf16.mxu0 %vm316_vm0, %v784_v3  ;;  %v787_v6 = vld [vmem:[%s220_s30 + $0x18] sm:$0xff]   ;;  %v788_v7 = vld [vmem:[%s220_s30 + $0x20] sm:$0xff]   ;;  %v789_v8 = vld [vmem:[%s220_s30 + $0x28] sm:$0xff]  }
  0x12   : > { %740 = vmatmul.mubr.msk.bf16.vlgmr.msra.gmra.mrb[0].mxu0 %vm316_vm0, %v785_v4  ;;  %v790_v9 = vld [vmem:[%s220_s30 + $0x30] sm:$0xff]   ;;  %v791_v10 = vld [vmem:[%s220_s30 + $0x38] sm:$0xff]  }
  0x13   : > { %743 = vmatprep.mubr.msk.bf16.mxu0 %vm316_vm0, %v786_v5  ;;  %v701_v5 = vld [vmem:[%s924_s4] ss:$0 sm:$0xff] }
  0x1a   : > { %744 = vmatmul.mubr.msk.bf16.gmra.mrb[4].mxu0 %vm316_vm0, %v787_v6 }
  0x1b   : > { %747 = vmatprep.mubr.msk.bf16.mxu0 %vm316_vm0, %v788_v7 }
  0x22   : > { %748 = vmatmul.mubr.msk.bf16.gmra.mrb[8].mxu0 %vm316_vm0, %v789_v8 }
  0x23   : > { %751 = vmatprep.mubr.msk.bf16.mxu0 %vm316_vm0, %v790_v9 }
  0x2a   : > { %752 = vmatmul.mubr.msk.bf16.gmra.mrb[12].mxu0 %vm316_vm0, %v791_v10 }
  0xe5   : > { %v741_v13 = vpop.f32.mrb[0].mxu0 }
  0xe6   : > { %v384_v14 = vadd.f32 %v741_v13, %v681_v12  ;;  %v375_v15 = vpop.f32.mrb[1].mxu0 }
  0xe7   : > { %v376_v16 = vadd.f32 %v681_v12, %v375_v15  ;;  %v742_v17 = vpop.f32.mrb[2].mxu0 }
  0xe8   : > { %v387_v18 = vadd.f32 %v742_v17, %v681_v12  ;;  %v378_v19 = vpop.f32.mrb[3].mxu0  ;;  %v440_v21 = vmax.f32 %v384_v14, 0.0 }
  0xe9   : > { %v379_v20 = vadd.f32 %v681_v12, %v378_v19  ;;  %v438_v23 = vmax.f32 %v376_v16, 0.0 }
  0xea   : > { %v441_v22 = vmax.f32 %v387_v18, 0.0 }
  0xeb   : > { %v439_v24 = vmax.f32 %v379_v20, 0.0 }
  0xec   : > { %v455_v25 = vpack.c.bf16 %v441_v22, %v440_v21 }
  0xed   : > { %v745_v26 = vpop.f32.mrb[4].mxu0  ;;  %v454_v27 = vpack.c.bf16 %v439_v24, %v438_v23 }
  0xee   : > { %v400_v28 = vadd.f32 %v745_v26, %v681_v12  ;;  %v391_v29 = vpop.f32.mrb[5].mxu0 }
  0xef   : > { %v392_v30 = vadd.f32 %v681_v12, %v391_v29  ;;  %v746_v31 = vpop.f32.mrb[6].mxu0  ;;  %757 = vmatprep.mubr.msk.bf16.mxu1 %vm477_vm1, %v454_v27 }
  0xf0   : > { %v403_v32 = vadd.f32 %v746_v31, %v681_v12  ;;  %v394_v33 = vpop.f32.mrb[7].mxu0  ;;  %758 = vmatmul.mubr.msk.bf16.vlgmr.msra.gmra.mrb[0].mxu1 %vm477_vm1, %v455_v25  ;;  %v444_v35 = vmax.f32 %v400_v28, 0.0 }
  0xf1   : > { %v395_v34 = vadd.f32 %v681_v12, %v394_v33  ;;  %v442_v37 = vmax.f32 %v392_v30, 0.0 }
  0xf2   : > { %v445_v36 = vmax.f32 %v403_v32, 0.0 }
  0xf3   : > { %v443_v38 = vmax.f32 %v395_v34, 0.0 }
  0xf4   : > { %v457_v39 = vpack.c.bf16 %v445_v36, %v444_v35 }
  0xf5   : > { %v456_v40 = vpack.c.bf16 %v443_v38, %v442_v37  ;;  %v749_v41 = vpop.f32.mrb[8].mxu0 }
  0xf6   : > { %v416_v42 = vadd.f32 %v749_v41, %v681_v12  ;;  %v407_v43 = vpop.f32.mrb[9].mxu0 }
  0xf7   : > { %v408_v44 = vadd.f32 %v681_v12, %v407_v43  ;;  %v750_v45 = vpop.f32.mrb[10].mxu0  ;;  %761 = vmatprep.mubr.msk.bf16.mxu1 %vm477_vm1, %v456_v40 }
  0xf8   : > { %v419_v46 = vadd.f32 %v750_v45, %v681_v12  ;;  %v410_v47 = vpop.f32.mrb[11].mxu0  ;;  %762 = vmatmul.mubr.msk.bf16.gmra.mrb[4].mxu1 %vm477_vm1, %v457_v39  ;;  %v448_v49 = vmax.f32 %v416_v42, 0.0 }
  0xf9   : > { %v411_v48 = vadd.f32 %v681_v12, %v410_v47  ;;  %v446_v51 = vmax.f32 %v408_v44, 0.0 }
  0xfa   : > { %v449_v50 = vmax.f32 %v419_v46, 0.0 }
  0xfb   : > { %v447_v52 = vmax.f32 %v411_v48, 0.0 }
  0xfc   : > { %v459_v53 = vpack.c.bf16 %v449_v50, %v448_v49 }
  0xfd   : > { %v458_v54 = vpack.c.bf16 %v447_v52, %v446_v51  ;;  %v753_v55 = vpop.f32.mrb[12].mxu0 }
  0xfe   : > { %v432_v56 = vadd.f32 %v753_v55, %v681_v12  ;;  %v423_v57 = vpop.f32.mrb[13].mxu0 }
  0xff   : > { %v424_v58 = vadd.f32 %v681_v12, %v423_v57  ;;  %v754_v59 = vpop.f32.mrb[14].mxu0  ;;  %765 = vmatprep.mubr.msk.bf16.mxu1 %vm477_vm1, %v458_v54 }
 0x100   : > { %v435_v60 = vadd.f32 %v754_v59, %v681_v12  ;;  %v426_v61 = vpop.f32.mrb[15].mxu0  ;;  %766 = vmatmul.mubr.msk.bf16.gmra.mrb[8].mxu1 %vm477_vm1, %v459_v53  ;;  %v452_v63 = vmax.f32 %v432_v56, 0.0 }
 0x101   : > { %v427_v62 = vadd.f32 %v681_v12, %v426_v61  ;;  %v450_v1 = vmax.f32 %v424_v58, 0.0 }
 0x102   : > { %v453_v0 = vmax.f32 %v435_v60, 0.0 }
 0x103   : > { %v451_v2 = vmax.f32 %v427_v62, 0.0 }
 0x104   : > { %v461_v3 = vpack.c.bf16 %v453_v0, %v452_v63 }
 0x105   : > { %v460_v4 = vpack.c.bf16 %v451_v2, %v450_v1 }
 0x107   : > { %769 = vmatprep.mubr.msk.bf16.mxu1 %vm477_vm1, %v460_v4 }
 0x108   : > { %770 = vmatmul.mubr.msk.bf16.gmra.mrb[12].mxu1 %vm477_vm1, %v461_v3 }
 0x1c3   : > { %v759_v6 = vpop.f32.mrb[0].mxu1 }
 0x1c4   : > { %v545_v7 = vadd.f32 %v759_v6, %v701_v5  ;;  %v536_v8 = vpop.f32.mrb[1].mxu1 }
 0x1c5   : > { %v537_v9 = vadd.f32 %v701_v5, %v536_v8  ;;  %v760_v10 = vpop.f32.mrb[2].mxu1 }
 0x1c6   : > { %602 = vst.msk [vmem:[%s883_s15 + $0x10] sm:$0xff] %vm599_vm2, %v545_v7  ;;  %v548_v11 = vadd.f32 %v760_v10, %v701_v5  ;;  %v539_v12 = vpop.f32.mrb[3].mxu1 }
 0x1c7   : > { %600 = vst.msk [vmem:[%s883_s15] sm:$0xff] %vm599_vm2, %v537_v9  ;;  %v540_v13 = vadd.f32 %v701_v5, %v539_v12 }
 0x1c8   : > { %603 = vst.msk [vmem:[%s883_s15 + $0x18] sm:$0xff] %vm599_vm2, %v548_v11 }
 0x1c9   : > { %601 = vst.msk [vmem:[%s883_s15 + $0x8] sm:$0xff] %vm599_vm2, %v540_v13 }
 0x1cb   : > { %v763_v14 = vpop.f32.mrb[4].mxu1 }
 0x1cc   : > { %v561_v15 = vadd.f32 %v763_v14, %v701_v5  ;;  %v552_v16 = vpop.f32.mrb[5].mxu1 }
 0x1cd   : > { %v553_v17 = vadd.f32 %v701_v5, %v552_v16  ;;  %v764_v18 = vpop.f32.mrb[6].mxu1 }
 0x1ce   : > { %606 = vst.msk [vmem:[%s883_s15 + $0x30] sm:$0xff] %vm599_vm2, %v561_v15  ;;  %v564_v19 = vadd.f32 %v764_v18, %v701_v5  ;;  %v555_v20 = vpop.f32.mrb[7].mxu1 }
 0x1cf   : > { %604 = vst.msk [vmem:[%s883_s15 + $0x20] sm:$0xff] %vm599_vm2, %v553_v17  ;;  %v556_v21 = vadd.f32 %v701_v5, %v555_v20 }
 0x1d0   : > { %607 = vst.msk [vmem:[%s883_s15 + $0x38] sm:$0xff] %vm599_vm2, %v564_v19 }
 0x1d1   : > { %605 = vst.msk [vmem:[%s883_s15 + $0x28] sm:$0xff] %vm599_vm2, %v556_v21 }
 0x1d3   : > { %v767_v22 = vpop.f32.mrb[8].mxu1 }
 0x1d4   : > { %v577_v23 = vadd.f32 %v767_v22, %v701_v5  ;;  %v568_v24 = vpop.f32.mrb[9].mxu1 }
 0x1d5   : > { %v569_v25 = vadd.f32 %v701_v5, %v568_v24  ;;  %v768_v26 = vpop.f32.mrb[10].mxu1 }
 0x1d6   : > { %610 = vst.msk [vmem:[%s883_s15 + $0x50] sm:$0xff] %vm599_vm2, %v577_v23  ;;  %v580_v27 = vadd.f32 %v768_v26, %v701_v5  ;;  %v571_v28 = vpop.f32.mrb[11].mxu1 }
 0x1d7   : > { %608 = vst.msk [vmem:[%s883_s15 + $0x40] sm:$0xff] %vm599_vm2, %v569_v25  ;;  %v572_v29 = vadd.f32 %v701_v5, %v571_v28 }
 0x1d8   : > { %611 = vst.msk [vmem:[%s883_s15 + $0x58] sm:$0xff] %vm599_vm2, %v580_v27 }
 0x1d9   : > { %609 = vst.msk [vmem:[%s883_s15 + $0x48] sm:$0xff] %vm599_vm2, %v572_v29 }
 0x1db   : > { %v771_v30 = vpop.f32.mrb[12].mxu1 }
 0x1dc   : > { %v593_v31 = vadd.f32 %v771_v30, %v701_v5  ;;  %v584_v32 = vpop.f32.mrb[13].mxu1 }
 0x1dd   : > { %v585_v33 = vadd.f32 %v701_v5, %v584_v32  ;;  %v772_v34 = vpop.f32.mrb[14].mxu1 }
 0x1de   : > { %614 = vst.msk [vmem:[%s883_s15 + $0x70] sm:$0xff] %vm599_vm2, %v593_v31  ;;  %v596_v35 = vadd.f32 %v772_v34, %v701_v5  ;;  %v587_v36 = vpop.f32.mrb[15].mxu1 }
 0x1df   : > { %612 = vst.msk [vmem:[%s883_s15 + $0x60] sm:$0xff] %vm599_vm2, %v585_v33  ;;  %v588_v37 = vadd.f32 %v701_v5, %v587_v36 }
 0x1e0   : > { %615 = vst.msk [vmem:[%s883_s15 + $0x78] sm:$0xff] %vm599_vm2, %v596_v35 }
 0x1e1   : > { %613 = vst.msk [vmem:[%s883_s15 + $0x68] sm:$0xff] %vm599_vm2, %v588_v37 }
 0x1e2 PF: > { %s15_s18 = sadd.s32 1, %s799_s18  }
 0x1e3   : > { %p12_p4 = scmp.ge.s32.totalorder %s15_s18, 4  }
 0x1e5   :  { %14 = sbr.rel (!%p12_p4) target bundleno = 1 (0x1), region = 70 }

</bundles_post_ra>
